<compile_context>
chip_gen: v7x
topology: tpu7x:2x2x1
jax: 0.10.0
libtpu: 0.0.40
codegen_flags: <defaults>
</compile_context>

<pallas_src>
import jax
import jax.numpy as jnp
from jax.experimental import pallas as pl
from jax.experimental.pallas import tpu as pltpu


def _mi_estimator_kernel(hist_ref, path_ref, glob_ref,
                         w1m_ref, b1m_ref, w2m_ref, b2m_ref,
                         w1g_ref, b1g_ref, w2g_ref, b2g_ref,
                         out_ref):
    hist = hist_ref[...]                          # [N, D] f32
    path = path_ref[...]                          # [N, D] f32
    glob = glob_ref[...]                          # [N, D] f32

    inv_n = 1.0 / hist.shape[0]

    def club_mean(x_b16, w1_ref, b1_ref, w2_ref, b2_ref, y):
        # mu = Linear(ReLU(Linear(x)))  -- MXU: bf16 x bf16 -> f32 accumulation.
        h = (jnp.dot(x_b16, w1_ref[...], preferred_element_type=jnp.float32)
             + b1_ref[...])                                        # [N, H] f32
        h = jnp.maximum(h, 0.0)
        mu = (jnp.dot(h.astype(jnp.bfloat16), w2_ref[...],
                      preferred_element_type=jnp.float32)
              + b2_ref[...])                                       # [N, D] f32
        # Collapsed CLUB epilogue (exact over the full batch):
        #   mean_i sum_d mu[i,d] * (y[i,d] - mean_j y[j,d])
        y_c = y - jnp.mean(y, axis=0, keepdims=True)
        return jnp.sum(mu * y_c) * inv_n

    hist_b = hist.astype(jnp.bfloat16)
    path_b = path.astype(jnp.bfloat16)
    # In-VMEM concat for the "global" CLUB term (no [N, 2D] HBM intermediate).
    xg_b = jnp.concatenate((hist_b, path_b), axis=1)               # [N, 2D] bf16

    val = (club_mean(hist_b, w1m_ref, b1m_ref, w2m_ref, b2m_ref, path)
           + club_mean(xg_b, w1g_ref, b1g_ref, w2g_ref, b2g_ref, glob))

    out_ref[...] = jnp.full(out_ref.shape, val, dtype=out_ref.dtype)


def _full_spec(shape):
    return pl.BlockSpec(tuple(shape), lambda i: (0,) * len(shape))


def mi_estimator_forward(histology, pathways, global_embed, params):
    """MIEstimator.forward: mimin(hist, path) + mimin_glob(cat(hist, path), global)."""
    w1m, b1m, w2m, b2m, w1g, b1g, w2g, b2g = params
    n, d = histology.shape
    hidden = w1m.shape[-1]

    # mimin: N*D*H + N*H*D ; glob: N*(2D)*H + N*H*D  (x2 for MAC)
    flops = 2 * (n * d * hidden + n * hidden * d) \
          + 2 * (n * 2 * d * hidden + n * hidden * d)
    bytes_accessed = sum(a.size * a.dtype.itemsize
                         for a in (histology, pathways, global_embed,
                                   w1m, b1m, w2m, b2m, w1g, b1g, w2g, b2g)) + 4

    grid_spec = pltpu.PrefetchScalarGridSpec(
        num_scalar_prefetch=0,
        grid=(1,),
        in_specs=[
            _full_spec((n, d)),            # histology
            _full_spec((n, d)),            # pathways
            _full_spec((n, d)),            # global_embed
            _full_spec(w1m.shape), _full_spec(b1m.shape),
            _full_spec(w2m.shape), _full_spec(b2m.shape),
            _full_spec(w1g.shape), _full_spec(b1g.shape),
            _full_spec(w2g.shape), _full_spec(b2g.shape),
        ],
        out_specs=pl.BlockSpec((1, 1), lambda i: (0, 0)),
    )

    out = pl.pallas_call(
        _mi_estimator_kernel,
        out_shape=jax.ShapeDtypeStruct((1, 1), jnp.float32),
        grid_spec=grid_spec,
        compiler_params=pltpu.CompilerParams(
            dimension_semantics=("arbitrary",)),
        cost_estimate=pl.CostEstimate(
            flops=flops, transcendentals=0, bytes_accessed=bytes_accessed),
    )(histology, pathways, global_embed,
      w1m, b1m, w2m, b2m, w1g, b1g, w2g, b2g)

    return out[0, 0]


def init_mi_params(key, dim=128, hidden=512):
    """Weights for both CLUBMean MLPs (bf16 weights, f32 biases)."""
    ks = jax.random.split(key, 8)
    sw, sb = 0.05, 0.01
    w1_m = jax.random.normal(ks[0], (dim, hidden), jnp.float32) * sw      # CLUBMean(dim, dim)
    b1_m = jax.random.normal(ks[1], (1, hidden), jnp.float32) * sb
    w2_m = jax.random.normal(ks[2], (hidden, dim), jnp.float32) * sw
    b2_m = jax.random.normal(ks[3], (1, dim), jnp.float32) * sb
    w1_g = jax.random.normal(ks[4], (2 * dim, hidden), jnp.float32) * sw  # CLUBMean(2*dim, dim)
    b1_g = jax.random.normal(ks[5], (1, hidden), jnp.float32) * sb
    w2_g = jax.random.normal(ks[6], (hidden, dim), jnp.float32) * sw
    b2_g = jax.random.normal(ks[7], (1, dim), jnp.float32) * sb

    # bf16 weight storage halves the dominant HBM DMA bytes; parity tests vs an
    # f32 PyTorch reference must account for this (tolerance ~2e-3).
    return (w1_m.astype(jnp.bfloat16), b1_m,
            w2_m.astype(jnp.bfloat16), b2_m,
            w1_g.astype(jnp.bfloat16), b1_g,
            w2_g.astype(jnp.bfloat16), b2_g)


def _club_mean_ref(x, y, w1, b1, w2, b2):
    """Pure-JAX CLUBMean.forward mirroring the PyTorch code (same bf16 matmul
    inputs / f32 accumulation as the kernel), used only for verification."""
    h = jnp.dot(x.astype(jnp.bfloat16), w1, preferred_element_type=jnp.float32) + b1
    h = jnp.maximum(h, 0.0)
    mu = jnp.dot(h.astype(jnp.bfloat16), w2, preferred_element_type=jnp.float32) + b2
    positive = -((mu - y) ** 2) / 2.0
    negative = -jnp.mean((y[None, :, :] - mu[:, None, :]) ** 2, axis=1) / 2.0
    return jnp.mean(positive.sum(axis=-1) - negative.sum(axis=-1))


if __name__ == "__main__":
    dim, hidden, batch = 128, 512, 8     # MIEstimator/CLUBMean defaults; batch = sublane dim

    key = jax.random.PRNGKey(0)
    k_h, k_p, k_g, k_w = jax.random.split(key, 4)
    histology = jax.random.normal(k_h, (batch, dim), jnp.float32)
    pathways = jax.random.normal(k_p, (batch, dim), jnp.float32)
    global_embed = jax.random.normal(k_g, (batch, dim), jnp.float32)

    params = init_mi_params(k_w, dim=dim, hidden=hidden)

    fwd = jax.jit(mi_estimator_forward)
    out = fwd(histology, pathways, global_embed, params)
    out = jax.block_until_ready(out)

    # Verify against a pure-JAX transcription of the PyTorch forward.
    w1m, b1m, w2m, b2m, w1g, b1g, w2g, b2g = params
    ref = (_club_mean_ref(histology, pathways, w1m, b1m, w2m, b2m)
           + _club_mean_ref(jnp.concatenate((histology, pathways), axis=1),
                            global_embed, w1g, b1g, w2g, b2g))
    assert jnp.allclose(out, ref, rtol=2e-3, atol=5e-3), (out, ref)

    # TODO(synk): loglikeli / learning_loss are training-time methods, not part
    # of forward, and are not ported.
    print("KERNEL_OK")
</pallas_src>

<mosaic_0001>
module attributes {stable_mosaic.version = 11 : i64} {
  func.func @_mi_estimator_kernel(%arg0: i32, %arg1: memref<8x128xf32, #tpu.memory_space<vmem>>, %arg2: memref<8x128xf32, #tpu.memory_space<vmem>>, %arg3: memref<8x128xf32, #tpu.memory_space<vmem>>, %arg4: memref<128x512xbf16, #tpu.memory_space<vmem>>, %arg5: memref<1x512xf32, #tpu.memory_space<vmem>>, %arg6: memref<512x128xbf16, #tpu.memory_space<vmem>>, %arg7: memref<1x128xf32, #tpu.memory_space<vmem>>, %arg8: memref<256x512xbf16, #tpu.memory_space<vmem>>, %arg9: memref<1x512xf32, #tpu.memory_space<vmem>>, %arg10: memref<512x128xbf16, #tpu.memory_space<vmem>>, %arg11: memref<1x128xf32, #tpu.memory_space<vmem>>, %arg12: memref<1x1xf32, #tpu.memory_space<vmem>>) attributes {dimension_semantics = [#tpu.dimension_semantics<arbitrary>], iteration_bounds = array<i64: 1>, scalar_prefetch = 0 : i64, scratch_operands = 0 : i64, tpu.core_type = #tpu.core_type<tc>, window_params = [{pipeline_mode = #tpu.pipeline_mode<synchronous>, transform_indices = @transform_0, window_bounds = array<i64: 8, 128>}, {pipeline_mode = #tpu.pipeline_mode<synchronous>, transform_indices = @transform_1, window_bounds = array<i64: 8, 128>}, {pipeline_mode = #tpu.pipeline_mode<synchronous>, transform_indices = @transform_2, window_bounds = array<i64: 8, 128>}, {pipeline_mode = #tpu.pipeline_mode<synchronous>, transform_indices = @transform_3, window_bounds = array<i64: 128, 512>}, {pipeline_mode = #tpu.pipeline_mode<synchronous>, transform_indices = @transform_4, window_bounds = array<i64: 1, 512>}, {pipeline_mode = #tpu.pipeline_mode<synchronous>, transform_indices = @transform_5, window_bounds = array<i64: 512, 128>}, {pipeline_mode = #tpu.pipeline_mode<synchronous>, transform_indices = @transform_6, window_bounds = array<i64: 1, 128>}, {pipeline_mode = #tpu.pipeline_mode<synchronous>, transform_indices = @transform_7, window_bounds = array<i64: 256, 512>}, {pipeline_mode = #tpu.pipeline_mode<synchronous>, transform_indices = @transform_8, window_bounds = array<i64: 1, 512>}, {pipeline_mode = #tpu.pipeline_mode<synchronous>, transform_indices = @transform_9, window_bounds = array<i64: 512, 128>}, {pipeline_mode = #tpu.pipeline_mode<synchronous>, transform_indices = @transform_10, window_bounds = array<i64: 1, 128>}, {pipeline_mode = #tpu.pipeline_mode<synchronous>, transform_indices = @transform_11, window_bounds = array<i64: 1, 1>}]} {
    %c0 = arith.constant 0 : index
    %c0_0 = arith.constant 0 : index
    %0 = vector.load %arg1[%c0, %c0_0] : memref<8x128xf32, #tpu.memory_space<vmem>>, vector<8x128xf32>
    %c0_1 = arith.constant 0 : index
    %c0_2 = arith.constant 0 : index
    %1 = vector.load %arg2[%c0_1, %c0_2] : memref<8x128xf32, #tpu.memory_space<vmem>>, vector<8x128xf32>
    %c0_3 = arith.constant 0 : index
    %c0_4 = arith.constant 0 : index
    %2 = vector.load %arg3[%c0_3, %c0_4] : memref<8x128xf32, #tpu.memory_space<vmem>>, vector<8x128xf32>
    %3 = arith.truncf %0 : vector<8x128xf32> to vector<8x128xbf16>
    %4 = arith.truncf %1 : vector<8x128xf32> to vector<8x128xbf16>
    %5 = tpu.concatenate %3, %4 in 1 : vector<8x128xbf16>, vector<8x128xbf16> -> vector<8x256xbf16>
    %c0_5 = arith.constant 0 : index
    %c0_6 = arith.constant 0 : index
    %6 = vector.load %arg4[%c0_5, %c0_6] : memref<128x512xbf16, #tpu.memory_space<vmem>>, vector<128x512xbf16>
    %cst = arith.constant dense<0.000000e+00> : vector<8x512xf32>
    %7 = tpu.matmul %3, %6, %cst {dimension_numbers = #tpu.dot_dimension_numbers<[1], [0], [0], [1], [0, 0, 1, 1], [], []>} : vector<8x128xbf16>, vector<128x512xbf16>, vector<8x512xf32> -> vector<8x512xf32>
    %c0_7 = arith.constant 0 : index
    %c0_8 = arith.constant 0 : index
    %8 = vector.load %arg5[%c0_7, %c0_8] : memref<1x512xf32, #tpu.memory_space<vmem>>, vector<1x512xf32>
    %9 = vector.broadcast %8 : vector<1x512xf32> to vector<8x512xf32>
    %10 = arith.addf %7, %9 : vector<8x512xf32>
    %cst_9 = arith.constant 0.000000e+00 : f32
    %11 = vector.broadcast %cst_9 : f32 to vector<8x512xf32>
    %12 = arith.maximumf %10, %11 : vector<8x512xf32>
    %13 = arith.truncf %12 : vector<8x512xf32> to vector<8x512xbf16>
    %c0_10 = arith.constant 0 : index
    %c0_11 = arith.constant 0 : index
    %14 = vector.load %arg6[%c0_10, %c0_11] : memref<512x128xbf16, #tpu.memory_space<vmem>>, vector<512x128xbf16>
    %cst_12 = arith.constant dense<0.000000e+00> : vector<8x128xf32>
    %15 = tpu.matmul %13, %14, %cst_12 {dimension_numbers = #tpu.dot_dimension_numbers<[1], [0], [0], [1], [0, 0, 1, 1], [], []>} : vector<8x512xbf16>, vector<512x128xbf16>, vector<8x128xf32> -> vector<8x128xf32>
    %c0_13 = arith.constant 0 : index
    %c0_14 = arith.constant 0 : index
    %16 = vector.load %arg7[%c0_13, %c0_14] : memref<1x128xf32, #tpu.memory_space<vmem>>, vector<1x128xf32>
    %17 = vector.broadcast %16 : vector<1x128xf32> to vector<8x128xf32>
    %18 = arith.addf %15, %17 : vector<8x128xf32>
    %cst_15 = arith.constant dense<0.000000e+00> : vector<128xf32>
    %19 = vector.multi_reduction <add>, %1, %cst_15 [0] : vector<8x128xf32> to vector<128xf32>
    %20 = vector.shape_cast %19 : vector<128xf32> to vector<1x128xf32>
    %cst_16 = arith.constant 8.000000e+00 : f32
    %21 = vector.broadcast %cst_16 : f32 to vector<1x128xf32>
    %22 = arith.divf %20, %21 : vector<1x128xf32>
    %23 = vector.broadcast %22 : vector<1x128xf32> to vector<8x128xf32>
    %24 = arith.subf %1, %23 : vector<8x128xf32>
    %25 = arith.mulf %18, %24 : vector<8x128xf32>
    %26 = vector.shape_cast %25 : vector<8x128xf32> to vector<1x8x128xf32>
    %cst_17 = arith.constant dense<0.000000e+00> : vector<1xf32>
    %27 = vector.multi_reduction <add>, %26, %cst_17 [1, 2] : vector<1x8x128xf32> to vector<1xf32>
    %28 = vector.shape_cast %27 : vector<1xf32> to vector<1x1x1xf32>
    %29 = vector.extract %28[0, 0, 0] : f32 from vector<1x1x1xf32>
    %cst_18 = arith.constant 1.250000e-01 : f32
    %30 = arith.mulf %29, %cst_18 : f32
    %c0_19 = arith.constant 0 : index
    %c0_20 = arith.constant 0 : index
    %31 = vector.load %arg8[%c0_19, %c0_20] : memref<256x512xbf16, #tpu.memory_space<vmem>>, vector<256x512xbf16>
    %cst_21 = arith.constant dense<0.000000e+00> : vector<8x512xf32>
    %32 = tpu.matmul %5, %31, %cst_21 {dimension_numbers = #tpu.dot_dimension_numbers<[1], [0], [0], [1], [0, 0, 1, 1], [], []>} : vector<8x256xbf16>, vector<256x512xbf16>, vector<8x512xf32> -> vector<8x512xf32>
    %c0_22 = arith.constant 0 : index
    %c0_23 = arith.constant 0 : index
    %33 = vector.load %arg9[%c0_22, %c0_23] : memref<1x512xf32, #tpu.memory_space<vmem>>, vector<1x512xf32>
    %34 = vector.broadcast %33 : vector<1x512xf32> to vector<8x512xf32>
    %35 = arith.addf %32, %34 : vector<8x512xf32>
    %cst_24 = arith.constant 0.000000e+00 : f32
    %36 = vector.broadcast %cst_24 : f32 to vector<8x512xf32>
    %37 = arith.maximumf %35, %36 : vector<8x512xf32>
    %38 = arith.truncf %37 : vector<8x512xf32> to vector<8x512xbf16>
    %c0_25 = arith.constant 0 : index
    %c0_26 = arith.constant 0 : index
    %39 = vector.load %arg10[%c0_25, %c0_26] : memref<512x128xbf16, #tpu.memory_space<vmem>>, vector<512x128xbf16>
    %cst_27 = arith.constant dense<0.000000e+00> : vector<8x128xf32>
    %40 = tpu.matmul %38, %39, %cst_27 {dimension_numbers = #tpu.dot_dimension_numbers<[1], [0], [0], [1], [0, 0, 1, 1], [], []>} : vector<8x512xbf16>, vector<512x128xbf16>, vector<8x128xf32> -> vector<8x128xf32>
    %c0_28 = arith.constant 0 : index
    %c0_29 = arith.constant 0 : index
    %41 = vector.load %arg11[%c0_28, %c0_29] : memref<1x128xf32, #tpu.memory_space<vmem>>, vector<1x128xf32>
    %42 = vector.broadcast %41 : vector<1x128xf32> to vector<8x128xf32>
    %43 = arith.addf %40, %42 : vector<8x128xf32>
    %cst_30 = arith.constant dense<0.000000e+00> : vector<128xf32>
    %44 = vector.multi_reduction <add>, %2, %cst_30 [0] : vector<8x128xf32> to vector<128xf32>
    %45 = vector.shape_cast %44 : vector<128xf32> to vector<1x128xf32>
    %cst_31 = arith.constant 8.000000e+00 : f32
    %46 = vector.broadcast %cst_31 : f32 to vector<1x128xf32>
    %47 = arith.divf %45, %46 : vector<1x128xf32>
    %48 = vector.broadcast %47 : vector<1x128xf32> to vector<8x128xf32>
    %49 = arith.subf %2, %48 : vector<8x128xf32>
    %50 = arith.mulf %43, %49 : vector<8x128xf32>
    %51 = vector.shape_cast %50 : vector<8x128xf32> to vector<1x8x128xf32>
    %cst_32 = arith.constant dense<0.000000e+00> : vector<1xf32>
    %52 = vector.multi_reduction <add>, %51, %cst_32 [1, 2] : vector<1x8x128xf32> to vector<1xf32>
    %53 = vector.shape_cast %52 : vector<1xf32> to vector<1x1x1xf32>
    %54 = vector.extract %53[0, 0, 0] : f32 from vector<1x1x1xf32>
    %cst_33 = arith.constant 1.250000e-01 : f32
    %55 = arith.mulf %54, %cst_33 : f32
    %56 = arith.addf %30, %55 : f32
    %57 = vector.broadcast %56 : f32 to vector<1x1xf32>
    %c0_34 = arith.constant 0 : index
    %c0_35 = arith.constant 0 : index
    %58 = vector.load %arg12[%c0_34, %c0_35] : memref<1x1xf32, #tpu.memory_space<vmem>>, vector<1x1xf32>
    tpu.vector_store %arg12[%c0_34, %c0_35], %57 {strides = array<i32>} : memref<1x1xf32, #tpu.memory_space<vmem>>, vector<1x1xf32>,
    return
  }
  func.func @transform_0(%arg0: i32) -> (i32, i32) {
    %c0_i32 = arith.constant 0 : i32
    %c0_i32_0 = arith.constant 0 : i32
    %c0_i32_1 = arith.constant 0 : i32
    return %c0_i32, %c0_i32_0 : i32, i32
  }
  func.func @transform_1(%arg0: i32) -> (i32, i32) {
    %c0_i32 = arith.constant 0 : i32
    %c0_i32_0 = arith.constant 0 : i32
    %c0_i32_1 = arith.constant 0 : i32
    return %c0_i32, %c0_i32_0 : i32, i32
  }
  func.func @transform_2(%arg0: i32) -> (i32, i32) {
    %c0_i32 = arith.constant 0 : i32
    %c0_i32_0 = arith.constant 0 : i32
    %c0_i32_1 = arith.constant 0 : i32
    return %c0_i32, %c0_i32_0 : i32, i32
  }
  func.func @transform_3(%arg0: i32) -> (i32, i32) {
    %c0_i32 = arith.constant 0 : i32
    %c0_i32_0 = arith.constant 0 : i32
    %c0_i32_1 = arith.constant 0 : i32
    return %c0_i32, %c0_i32_0 : i32, i32
  }
  func.func @transform_4(%arg0: i32) -> (i32, i32) {
    %c0_i32 = arith.constant 0 : i32
    %c0_i32_0 = arith.constant 0 : i32
    %c0_i32_1 = arith.constant 0 : i32
    return %c0_i32, %c0_i32_0 : i32, i32
  }
  func.func @transform_5(%arg0: i32) -> (i32, i32) {
    %c0_i32 = arith.constant 0 : i32
    %c0_i32_0 = arith.constant 0 : i32
    %c0_i32_1 = arith.constant 0 : i32
    return %c0_i32, %c0_i32_0 : i32, i32
  }
  func.func @transform_6(%arg0: i32) -> (i32, i32) {
    %c0_i32 = arith.constant 0 : i32
    %c0_i32_0 = arith.constant 0 : i32
    %c0_i32_1 = arith.constant 0 : i32
    return %c0_i32, %c0_i32_0 : i32, i32
  }
  func.func @transform_7(%arg0: i32) -> (i32, i32) {
    %c0_i32 = arith.constant 0 : i32
    %c0_i32_0 = arith.constant 0 : i32
    %c0_i32_1 = arith.constant 0 : i32
    return %c0_i32, %c0_i32_0 : i32, i32
  }
  func.func @transform_8(%arg0: i32) -> (i32, i32) {
    %c0_i32 = arith.constant 0 : i32
    %c0_i32_0 = arith.constant 0 : i32
    %c0_i32_1 = arith.constant 0 : i32
    return %c0_i32, %c0_i32_0 : i32, i32
  }
  func.func @transform_9(%arg0: i32) -> (i32, i32) {
    %c0_i32 = arith.constant 0 : i32
    %c0_i32_0 = arith.constant 0 : i32
    %c0_i32_1 = arith.constant 0 : i32
    return %c0_i32, %c0_i32_0 : i32, i32
  }
  func.func @transform_10(%arg0: i32) -> (i32, i32) {
    %c0_i32 = arith.constant 0 : i32
    %c0_i32_0 = arith.constant 0 : i32
    %c0_i32_1 = arith.constant 0 : i32
    return %c0_i32, %c0_i32_0 : i32, i32
  }
  func.func @transform_11(%arg0: i32) -> (i32, i32) {
    %c0_i32 = arith.constant 0 : i32
    %c0_i32_0 = arith.constant 0 : i32
    %c0_i32_1 = arith.constant 0 : i32
    return %c0_i32, %c0_i32_0 : i32, i32
  }
}

</mosaic_0001>

<bundles_post_ra>
// kernel: mi_estimator_forward.1
= control target key start
LH: loop header
LB: loop body
LE: loop exit
PB: predicated region body
PF: predicated region fallthrough
CT: control target
= control target key end

     0   :  { %16 = vsyncpa [#allocation3], 0  ;;  %s2572_s0 = inlined_call_operand.hbm [shape: f32[8,128], index: 0, kind: input, shape index: {}]   ;;  %s2573_s1 = inlined_call_operand.hbm [shape: f32[8,128], index: 1, kind: input, shape index: {}]   ;;  %s2574_s2 = inlined_call_operand.hbm [shape: f32[8,128], index: 2, kind: input, shape index: {}]   ;;  %s2575_s3 = inlined_call_operand.hbm [shape: bf16[128,512], index: 3, kind: input, shape index: {}]   ;;  %s2576_s4 = inlined_call_operand.vmem [shape: f32[1,512], index: 4, kind: input, shape index: {}]   ;;  %s2577_s5 = inlined_call_operand.hbm [shape: bf16[512,128], index: 5, kind: input, shape index: {}]   ;;  %s2578_s6 = inlined_call_operand.vmem [shape: f32[1,128], index: 6, kind: input, shape index: {}]   ;;  %s2579_s7 = inlined_call_operand.hbm [shape: bf16[256,512], index: 7, kind: input, shape index: {}]   ;;  %s2580_s8 = inlined_call_operand.vmem [shape: f32[1,512], index: 8, kind: input, shape index: {}]   ;;  %s2581_s9 = inlined_call_operand.hbm [shape: bf16[512,128], index: 9, kind: input, shape index: {}]   ;;  %s2582_s10 = inlined_call_operand.vmem [shape: f32[1,128], index: 10, kind: input, shape index: {}]   ;;  %s2583_s11 = inlined_call_operand.hbm [shape: f32[1,1], index: 11, kind: output, shape index: {}]  }
   0x1   :  { %17 = vsyncpa [#allocation6], 0 }
   0x2   :  { %18 = vsyncpa [#allocation9], 0 }
   0x3   :  { %19 = vsyncpa [#allocation12], 0 }
   0x4   :  { %20 = vsyncpa [#allocation4], 0  ;;  %s2342_s17 = smov [#allocation5]   ;;  %s2343_s19 = smov [#allocation8]  }
   0x5   :  { %s37_s18 = sshll.u32 %s2342_s17, 4  ;;  %s56_s20 = sshll.u32 %s2343_s19, 4  ;;  %s38_s18 = int_to_ptr.vmem [resolvable:$true] %s37_s18  ;;  %s2415_s20 = int_to_ptr.vmem [resolvable:$true] %s56_s20 }
   0x6   :  { %s2156_s23 = scalar_lea.hbm %s2573_s1, 128 }
   0x7   :  { %p2157_p0 = scmp.ne.s32.totalorder %s2573_s1, %s2156_s23  ;;  %p2160_p1 = scmp.lt.u32.totalorder %s2156_s23, %s2573_s1 }
   0x9   :  { %p2162_p2 = pnand %p2160_p1, %p2157_p0 }
   0xb   :  { %2165 = shalt.err (!%p2162_p2)
}
   0xc   :  { %s2166_s28 = scalar_lea.vmem %s38_s18, 128  ;;  %p2171_p4 = scmp.lt.s32.totalorder %s38_s18, %s38_s18 }
   0xd   :  { %p2167_p3 = scmp.ne.s32.totalorder %s38_s18, %s2166_s28  ;;  %p2172_p5 = scmp.lt.s32.totalorder %s2166_s28, %s2166_s28 }
   0xf   :  { %p2173_p6 = por %p2172_p5, %p2171_p4 }
  0x11   :  { %p2174_p7 = pnand %p2173_p6, %p2167_p3 }
  0x13   :  { %2177 = shalt.err (!%p2174_p7)
}
  0x14   :  { %40 = dma.hbm_to_vmem [thread:$0]  %s2573_s1, 128, %s38_s18, [#allocation6]  }
  0x15   :  { %s2178_s14 = scalar_lea.hbm %s2575_s3, 4096 }
  0x16   :  { %p2179_p8 = scmp.ne.s32.totalorder %s2575_s3, %s2178_s14  ;;  %p2182_p9 = scmp.lt.u32.totalorder %s2178_s14, %s2575_s3 }
  0x18   :  { %p2184_p10 = pnand %p2182_p9, %p2179_p8 }
  0x1a   :  { %2187 = shalt.err (!%p2184_p10)
}
  0x1b   :  { %s2188_s21 = scalar_lea.vmem %s2415_s20, 4096  ;;  %p2193_p12 = scmp.lt.s32.totalorder %s2415_s20, %s2415_s20 }
  0x1c   :  { %p2189_p11 = scmp.ne.s32.totalorder %s2415_s20, %s2188_s21  ;;  %p2194_p13 = scmp.lt.s32.totalorder %s2188_s21, %s2188_s21 }
  0x1e   :  { %p2195_p0 = por %p2194_p13, %p2193_p12 }
  0x20   :  { %p2196_p1 = pnand %p2195_p0, %p2189_p11 }
  0x22   :  { %2199 = shalt.err (!%p2196_p1)
}
  0x23   :  { %s2344_s1 = smov 256   ;;  %s2345_s18 = smov 16  }
  0x24   :  { %62 = dma.hbm_to_vmem [thread:$0]  %s2575_s3, 4096, %s2415_s20, [#allocation9], %s2344_s1, %s2344_s1, %s2345_s18  }
  0x25   :  { %s2346_s24 = smov [#allocation11]   ;;  %s2347_s26 = smov [#allocation2]  }
  0x26   :  { %s84_s25 = sshll.u32 %s2346_s24, 4  ;;  %s27_s27 = sshll.u32 %s2347_s26, 4  ;;  %s85_s25 = int_to_ptr.vmem [resolvable:$true] %s84_s25  ;;  %s28_s27 = int_to_ptr.vmem [resolvable:$true] %s27_s27 }
  0x27   :  { %s2200_s30 = scalar_lea.hbm %s2579_s7, 8192 }
  0x28   :  { %p2201_p2 = scmp.ne.s32.totalorder %s2579_s7, %s2200_s30  ;;  %p2204_p3 = scmp.lt.u32.totalorder %s2200_s30, %s2579_s7 }
  0x2a   :  { %p2206_p4 = pnand %p2204_p3, %p2201_p2 }
  0x2c   :  { %2209 = shalt.err (!%p2206_p4)
}
  0x2d   :  { %s2210_s3 = scalar_lea.vmem %s85_s25, 8192  ;;  %p2215_p6 = scmp.lt.s32.totalorder %s85_s25, %s85_s25 }
  0x2e   :  { %p2211_p5 = scmp.ne.s32.totalorder %s85_s25, %s2210_s3  ;;  %p2216_p7 = scmp.lt.s32.totalorder %s2210_s3, %s2210_s3 }
  0x30   :  { %p2217_p8 = por %p2216_p7, %p2215_p6 }
  0x32   :  { %p2218_p9 = pnand %p2217_p8, %p2211_p5 }
  0x34   :  { %2221 = shalt.err (!%p2218_p9)
}
  0x35   :  { %90 = dma.hbm_to_vmem [thread:$0]  %s2579_s7, 8192, %s85_s25, [#allocation12], %s2344_s1, %s2344_s1, %s2345_s18  }
  0x36   :  { %s2222_s21 = scalar_lea.hbm %s2572_s0, 128 }
  0x37   :  { %p2223_p10 = scmp.ne.s32.totalorder %s2572_s0, %s2222_s21  ;;  %p2226_p11 = scmp.lt.u32.totalorder %s2222_s21, %s2572_s0 }
  0x39   :  { %p2228_p12 = pnand %p2226_p11, %p2223_p10 }
  0x3b   :  { %2231 = shalt.err (!%p2228_p12)
}
  0x3c   :  { %s2232_s28 = scalar_lea.vmem %s28_s27, 128  ;;  %p2237_p0 = scmp.lt.s32.totalorder %s28_s27, %s28_s27 }
  0x3d   :  { %p2233_p13 = scmp.ne.s32.totalorder %s28_s27, %s2232_s28  ;;  %p2238_p1 = scmp.lt.s32.totalorder %s2232_s28, %s2232_s28 }
  0x3f   :  { %p2239_p2 = por %p2238_p1, %p2237_p0 }
  0x41   :  { %p2240_p3 = pnand %p2239_p2, %p2233_p13 }
  0x43   :  { %2243 = shalt.err (!%p2240_p3)
}
  0x44   :  { %30 = dma.hbm_to_vmem [thread:$0]  %s2572_s0, 128, %s28_s27, [#allocation3]  }
  0x45   :  { %s2348_s18 = smov [#allocation7]   ;;  %s2349_s29 = smov [#allocation10]  }
  0x46   :  { %s47_s25 = sshll.u32 %s2348_s18, 4  ;;  %s70_s30 = sshll.u32 %s2349_s29, 4  ;;  %s48_s25 = int_to_ptr.vmem [resolvable:$true] %s47_s25  ;;  %s2470_s30 = int_to_ptr.vmem [resolvable:$true] %s70_s30 }
  0x47   :  { %s2244_s14 = scalar_lea.hbm %s2574_s2, 128 }
  0x48   :  { %p2245_p4 = scmp.ne.s32.totalorder %s2574_s2, %s2244_s14  ;;  %p2248_p5 = scmp.lt.u32.totalorder %s2244_s14, %s2574_s2 }
  0x4a   :  { %p2250_p6 = pnand %p2248_p5, %p2245_p4 }
  0x4c   :  { %2253 = shalt.err (!%p2250_p6)
}
  0x4d   :  { %s2254_s0 = scalar_lea.vmem %s48_s25, 128  ;;  %p2259_p8 = scmp.lt.s32.totalorder %s48_s25, %s48_s25 }
  0x4e   :  { %p2255_p7 = scmp.ne.s32.totalorder %s48_s25, %s2254_s0  ;;  %p2260_p9 = scmp.lt.s32.totalorder %s2254_s0, %s2254_s0 }
  0x50   :  { %p2261_p10 = por %p2260_p9, %p2259_p8 }
  0x52   :  { %p2262_p11 = pnand %p2261_p10, %p2255_p7 }
  0x54   :  { %2265 = shalt.err (!%p2262_p11)
}
  0x55   :  { %50 = dma.hbm_to_vmem [thread:$0]  %s2574_s2, 128, %s48_s25, [#allocation6]  }
  0x56   :  { %s2266_s22 = scalar_lea.hbm %s2577_s5, 4096 }
  0x57   :  { %p2267_p12 = scmp.ne.s32.totalorder %s2577_s5, %s2266_s22  ;;  %p2270_p13 = scmp.lt.u32.totalorder %s2266_s22, %s2577_s5 }
  0x59   :  { %p2272_p0 = pnand %p2270_p13, %p2267_p12 }
  0x5b   :  { %2275 = shalt.err (!%p2272_p0)
}
  0x5c   :  { %s2276_s7 = scalar_lea.vmem %s2470_s30, 4096  ;;  %p2281_p2 = scmp.lt.s32.totalorder %s2470_s30, %s2470_s30 }
  0x5d   :  { %p2277_p1 = scmp.ne.s32.totalorder %s2470_s30, %s2276_s7  ;;  %p2282_p3 = scmp.lt.s32.totalorder %s2276_s7, %s2276_s7 }
  0x5f   :  { %p2283_p4 = por %p2282_p3, %p2281_p2 }
  0x61   :  { %p2284_p5 = pnand %p2283_p4, %p2277_p1 }
  0x63   :  { %2287 = shalt.err (!%p2284_p5)
}
  0x64   :  { %s2350_s2 = smov 64   ;;  %s2351_s1 = smov 4  }
  0x65   :  { %76 = dma.hbm_to_vmem [thread:$0]  %s2577_s5, 4096, %s2470_s30, [#allocation9], %s2350_s2, %s2350_s2, %s2351_s1  }
  0x66   :  { %s2352_s29 = smov [#allocation13]   ;;  %s2288_s15 = scalar_lea.hbm %s2581_s9, 4096 }
  0x67   :  { %s98_s12 = sshll.u32 %s2352_s29, 4  ;;  %p2289_p6 = scmp.ne.s32.totalorder %s2581_s9, %s2288_s15  ;;  %s99_s12 = int_to_ptr.vmem [resolvable:$true] %s98_s12 }
  0x68   :  { %p2292_p7 = scmp.lt.u32.totalorder %s2288_s15, %s2581_s9 }
  0x6a   :  { %p2294_p8 = pnand %p2292_p7, %p2289_p6 }
  0x6c   :  { %2297 = shalt.err (!%p2294_p8)
}
  0x6d   :  { %s2298_s27 = scalar_lea.vmem %s99_s12, 4096  ;;  %p2303_p10 = scmp.lt.s32.totalorder %s99_s12, %s99_s12 }
  0x6e   :  { %p2299_p9 = scmp.ne.s32.totalorder %s99_s12, %s2298_s27  ;;  %p2304_p11 = scmp.lt.s32.totalorder %s2298_s27, %s2298_s27 }
  0x70   :  { %p2305_p12 = por %p2304_p11, %p2303_p10 }
  0x72   :  { %p2306_p13 = pnand %p2305_p12, %p2299_p9 }
  0x74   :  { %2309 = shalt.err (!%p2306_p13)
}
  0x75   :  { %104 = dma.hbm_to_vmem [thread:$0]  %s2581_s9, 4096, %s99_s12, [#allocation12], %s2350_s2, %s2350_s2, %s2351_s1  }
  0x76   :  { %2332 = dma.done.wait [#allocation3], 128  }
  0x77   :  { %2333 = vsyncadd [#allocation3], 4294967168 }
  0x78   :  { %2334 = dma.done.wait [#allocation6], 256  }
  0x79   :  { %2335 = vsyncadd [#allocation6], 4294967040 }
  0x7a   :  { %2336 = dma.done.wait [#allocation9], 8192  }
  0x7b   :  { %2337 = vsyncadd [#allocation9], 4294959104 }
  0x7c   :  { %2338 = dma.done.wait [#allocation12], 12288  }
  0x7d   :  { %2339 = vsyncadd [#allocation12], 4294955008  ;;  %v2353_v0 = vmov 0   ;;  %v1948_v1 = vld [vmem:[#allocation8 + $0x4] ss:$16 sps:$4 sm:$0xff]   ;;  %v129_v33 = vld [vmem:[#allocation2] sm:$0xff] }
  0x7e   :  { %380 = vmatprep.mubr.bf16.mxu0 %v2353_v0  ;;  %421 = vmatprep.mubr.bf16.mxu1 %v2353_v0  ;;  %v1950_v2 = vld [vmem:[#allocation8 + $0xc] ss:$16 sps:$4 sm:$0xff]   ;;  %v1952_v3 = vld [vmem:[#allocation8] ss:$16 sps:$4 sm:$0xff]   ;;  %v1953_v4 = vld [vmem:[#allocation8 + $0x8] ss:$16 sps:$4 sm:$0xff]   ;;  %v2513_v37 = vpack.c.bf16 %v129_v33, %v129_v33 }
  0x7f   :  { %348 = vmatprep.subr.bf16.mxu0 %v1948_v1  ;;  %389 = vmatprep.subr.bf16.mxu1 %v1950_v2  ;;  %v1954_v5 = vld [vmem:[#allocation8 + $0x24] ss:$16 sps:$4 sm:$0xff]   ;;  %v1956_v6 = vld [vmem:[#allocation8 + $0x2c] ss:$16 sps:$4 sm:$0xff]   ;;  %v1958_v7 = vld [vmem:[#allocation8 + $0x20] ss:$16 sps:$4 sm:$0xff]  }
  0x80   :  { %349 = vmatpush1.bf16.msra.mxu0 %v1952_v3  ;;  %390 = vmatpush1.bf16.msra.mxu1 %v1953_v4  ;;  %v1959_v8 = vld [vmem:[#allocation8 + $0x28] ss:$16 sps:$4 sm:$0xff]   ;;  %v1960_v9 = vld [vmem:[#allocation8 + $0x44] ss:$16 sps:$4 sm:$0xff]   ;;  %v1962_v10 = vld [vmem:[#allocation8 + $0x4c] ss:$16 sps:$4 sm:$0xff]  }
  0x81   :  { %350 = vmatprep.subr.bf16.mxu0 %v1954_v5  ;;  %391 = vmatprep.subr.bf16.mxu1 %v1956_v6  ;;  %v1964_v11 = vld [vmem:[#allocation8 + $0x40] ss:$16 sps:$4 sm:$0xff]   ;;  %v1965_v12 = vld [vmem:[#allocation8 + $0x48] ss:$16 sps:$4 sm:$0xff]   ;;  %v1966_v13 = vld [vmem:[#allocation8 + $0x64] ss:$16 sps:$4 sm:$0xff]   ;;  %v168_v5 = vlaneseq }
  0x82   :  { %v1968_v14 = vld [vmem:[#allocation8 + $0x6c] ss:$16 sps:$4 sm:$0xff]   ;;  %v1970_v15 = vld [vmem:[#allocation8 + $0x60] ss:$16 sps:$4 sm:$0xff]   ;;  %v1971_v16 = vld [vmem:[#allocation8 + $0x68] ss:$16 sps:$4 sm:$0xff]  }
  0x83   :  { %v1972_v17 = vld [vmem:[#allocation8 + $0x84] ss:$16 sps:$4 sm:$0xff]   ;;  %v1974_v18 = vld [vmem:[#allocation8 + $0x8c] ss:$16 sps:$4 sm:$0xff]   ;;  %v1976_v19 = vld [vmem:[#allocation8 + $0x80] ss:$16 sps:$4 sm:$0xff]  }
  0x84   :  { %351 = vmatpush1.bf16.msra.mxu0 %v1958_v7  ;;  %392 = vmatpush1.bf16.msra.mxu1 %v1959_v8  ;;  %v1977_v20 = vld [vmem:[#allocation8 + $0x88] ss:$16 sps:$4 sm:$0xff]   ;;  %v1978_v21 = vld [vmem:[#allocation8 + $0xa4] ss:$16 sps:$4 sm:$0xff]   ;;  %v1980_v22 = vld [vmem:[#allocation8 + $0xac] ss:$16 sps:$4 sm:$0xff]  }
  0x85   :  { %352 = vmatprep.subr.bf16.mxu0 %v1960_v9  ;;  %393 = vmatprep.subr.bf16.mxu1 %v1962_v10  ;;  %v1982_v23 = vld [vmem:[#allocation8 + $0xa0] ss:$16 sps:$4 sm:$0xff]   ;;  %v1983_v24 = vld [vmem:[#allocation8 + $0xa8] ss:$16 sps:$4 sm:$0xff]   ;;  %v1984_v25 = vld [vmem:[#allocation8 + $0xc4] ss:$16 sps:$4 sm:$0xff]  }
  0x86   :  { %v1986_v26 = vld [vmem:[#allocation8 + $0xcc] ss:$16 sps:$4 sm:$0xff]   ;;  %v1988_v27 = vld [vmem:[#allocation8 + $0xc0] ss:$16 sps:$4 sm:$0xff]   ;;  %v1989_v28 = vld [vmem:[#allocation8 + $0xc8] ss:$16 sps:$4 sm:$0xff]  }
  0x87   :  { %v1990_v29 = vld [vmem:[#allocation8 + $0xe4] ss:$16 sps:$4 sm:$0xff]   ;;  %v1992_v30 = vld [vmem:[#allocation8 + $0xec] ss:$16 sps:$4 sm:$0xff]   ;;  %v1994_v31 = vld [vmem:[#allocation8 + $0xe0] ss:$16 sps:$4 sm:$0xff]  }
  0x88   :  { %353 = vmatpush1.bf16.msra.mxu0 %v1964_v11  ;;  %394 = vmatpush1.bf16.msra.mxu1 %v1965_v12  ;;  %v1995_v32 = vld [vmem:[#allocation8 + $0xe8] ss:$16 sps:$4 sm:$0xff]   ;;  %v1996_v34 = vld [vmem:[#allocation10 + $0x40] sm:$0xff]   ;;  %v2004_v43 = vld [vmem:[#allocation10 + $0x50] sm:$0xff]   ;;  %v2517_v6 = vshrl.u32 %v168_v5, 7  ;;  %s2354_s28 = smov [#allocation14]  }
  0x89   :  { %354 = vmatprep.subr.bf16.mxu0 %v1966_v13  ;;  %395 = vmatprep.subr.bf16.mxu1 %v1968_v14  ;;  %v1997_v35 = vld [vmem:[#allocation10 + $0xc0] sm:$0xff]   ;;  %v2000_v39 = vld [vmem:[#allocation10 + $0x48] sm:$0xff]   ;;  %v2005_v44 = vld [vmem:[#allocation10 + $0xd0] sm:$0xff]   ;;  %s1669_s7 = sshll.u32 %s2354_s28, 4  ;;  %vm1661_vm0 = vcmask 0   ;;  %s1670_s7 = int_to_ptr.vmem [resolvable:$true] %s1669_s7 }
  0x8a   :  { %v1998_v36 = vld [vmem:[#allocation10] sm:$0xff]   ;;  %v2001_v40 = vld [vmem:[#allocation10 + $0xc8] sm:$0xff]   ;;  %v2006_v45 = vld [vmem:[#allocation10 + $0x10] sm:$0xff]   ;;  %v170_v7 = vsub.s32 0, %v2517_v6  ;;  %v178_v8 = vsub.s32 2, %v2517_v6  ;;  %v174_v10 = vsub.s32 1, %v2517_v6  ;;  %p2315_p1 = scmp.lt.s32.totalorder %s1670_s7, %s1670_s7 }
  0x8b   :  { %v1999_v38 = vld [vmem:[#allocation10 + $0x80] sm:$0xff]   ;;  %v2002_v41 = vld [vmem:[#allocation10 + $0x8] sm:$0xff]   ;;  %v2007_v46 = vld [vmem:[#allocation10 + $0x90] sm:$0xff]   ;;  %v182_v11 = vsub.s32 3, %v2517_v6  ;;  %s2310_s1 = scalar_lea.vmem %s1670_s7, 16  ;;  %s2314_s18 = scalar_lea.vmem %s1670_s7, 32 }
  0x8c   :  { %355 = vmatpush1.bf16.msra.mxu0 %v1970_v15  ;;  %396 = vmatpush1.bf16.msra.mxu1 %v1971_v16  ;;  %v2003_v42 = vld [vmem:[#allocation10 + $0x88] sm:$0xff]   ;;  %v2008_v47 = vld [vmem:[#allocation10 + $0x58] sm:$0xff]   ;;  %v2012_v51 = vld [vmem:[#allocation10 + $0x60] sm:$0xff]   ;;  %p2311_p0 = scmp.ne.s32.totalorder %s1670_s7, %s2310_s1  ;;  %p2316_p2 = scmp.lt.s32.totalorder %s2314_s18, %s2310_s1 }
  0x8d   :  { %356 = vmatprep.subr.bf16.mxu0 %v1972_v17  ;;  %397 = vmatprep.subr.bf16.mxu1 %v1974_v18  ;;  %v2009_v48 = vld [vmem:[#allocation10 + $0xd8] sm:$0xff]   ;;  %v2013_v52 = vld [vmem:[#allocation10 + $0xe0] sm:$0xff]   ;;  %v2016_v55 = vld [vmem:[#allocation10 + $0x68] sm:$0xff]  }
  0x8e   :  { %v2010_v49 = vld [vmem:[#allocation10 + $0x18] sm:$0xff]   ;;  %v2014_v53 = vld [vmem:[#allocation10 + $0x20] sm:$0xff]   ;;  %v2017_v56 = vld [vmem:[#allocation10 + $0xe8] sm:$0xff]   ;;  %p2317_p3 = por %p2316_p2, %p2315_p1 }
  0x8f   :  { %v2011_v50 = vld [vmem:[#allocation10 + $0x98] sm:$0xff]   ;;  %v2015_v54 = vld [vmem:[#allocation10 + $0xa0] sm:$0xff]   ;;  %v2018_v57 = vld [vmem:[#allocation10 + $0x28] sm:$0xff]  }
  0x90   :  { %357 = vmatpush1.bf16.msra.mxu0 %v1976_v19  ;;  %398 = vmatpush1.bf16.msra.mxu1 %v1977_v20  ;;  %v2019_v58 = vld [vmem:[#allocation10 + $0xa8] sm:$0xff]   ;;  %v2020_v59 = vld [vmem:[#allocation10 + $0x70] sm:$0xff]   ;;  %v2024_v63 = vld [vmem:[#allocation10 + $0x78] sm:$0xff]   ;;  %p2318_p4 = pnand %p2317_p3, %p2311_p0 }
  0x91   :  { %358 = vmatprep.subr.bf16.mxu0 %v1978_v21  ;;  %399 = vmatprep.subr.bf16.mxu1 %v1980_v22  ;;  %v2021_v60 = vld [vmem:[#allocation10 + $0xf0] sm:$0xff]   ;;  %v2025_v0 = vld [vmem:[#allocation10 + $0xf8] sm:$0xff]   ;;  %v166_v9 = vld [vmem:[%s2576_s4] sm:$0xf] }
  0x92   :  { %v2022_v61 = vld [vmem:[#allocation10 + $0x30] sm:$0xff]   ;;  %v2026_v1 = vld [vmem:[#allocation10 + $0x38] sm:$0xff]   ;;  %v171_v12 = vrot.slane %v166_v9, %v170_v7  ;;  %v179_v13 = vrot.slane %v166_v9, %v178_v8  ;;  %v175_v14 = vrot.slane %v166_v9, %v174_v10  ;;  %v183_v15 = vrot.slane %v166_v9, %v182_v11 }
  0x93   :  { %v2023_v62 = vld [vmem:[#allocation10 + $0xb0] sm:$0xff]   ;;  %v2027_v2 = vld [vmem:[#allocation10 + $0xb8] sm:$0xff]  }
  0x94   :  { %359 = vmatpush1.bf16.msra.mxu0 %v1982_v23  ;;  %400 = vmatpush1.bf16.msra.mxu1 %v1983_v24  ;;  %v2030_v3 = vld [vmem:[#allocation11 + $0x4] ss:$16 sps:$4 sm:$0xff]   ;;  %v2033_v4 = vld [vmem:[#allocation11 + $0xc] ss:$16 sps:$4 sm:$0xff]  }
  0x95   :  { %360 = vmatprep.subr.bf16.mxu0 %v1984_v25  ;;  %401 = vmatprep.subr.bf16.mxu1 %v1986_v26  ;;  %v2534_v33 = vld [vmem:[#allocation5] sm:$0xff]  ;;  %v2081_v9 = vld [vmem:[#allocation11 + $0x10c] ss:$16 sps:$4 sm:$0xff]  }
  0x96   :  { %v2078_v5 = vld [vmem:[#allocation11 + $0x104] ss:$16 sps:$4 sm:$0xff]  }
  0x98   :  { %361 = vmatpush1.bf16.msra.mxu0 %v1988_v27  ;;  %402 = vmatpush1.bf16.msra.mxu1 %v1989_v28 }
  0x99   :  { %362 = vmatprep.subr.bf16.mxu0 %v1990_v29  ;;  %403 = vmatprep.subr.bf16.mxu1 %v1992_v30 }
  0x9c   :  { %363 = vmatpush1.bf16.msra.mxu0 %v1994_v31  ;;  %404 = vmatpush1.bf16.msra.mxu1 %v1995_v32 }
  0x9d   :  { %1843 = vmatprep.subr.bf16.mxu0 %v1996_v34  ;;  %1865 = vmatprep.subr.bf16.mxu1 %v1997_v35 }
  0x9f   :  { %381 = vmatmul.mubr.bf16.vlgmr.msra.gmra.mrb[0].mxu0 %v2513_v37  ;;  %422 = vmatmul.mubr.bf16.vlgmr.msra.gmra.mrb[0].mxu1 %v2513_v37 }
  0xa0   :  { %1844 = vmatpush3.bf16.msra.mxu0 %v1998_v36  ;;  %1866 = vmatpush3.bf16.msra.mxu1 %v1999_v38  ;;  %v2028_v36 = vld [vmem:[#allocation11] ss:$16 sps:$4 sm:$0xff]   ;;  %v2031_v38 = vld [vmem:[#allocation11 + $0x8] ss:$16 sps:$4 sm:$0xff]  }
  0xa1   :  { %1845 = vmatprep.subr.bf16.mxu0 %v2000_v39  ;;  %1867 = vmatprep.subr.bf16.mxu1 %v2001_v40  ;;  %v2036_v40 = vld [vmem:[#allocation11 + $0x24] ss:$16 sps:$4 sm:$0xff]  }
  0xa4   :  { %1846 = vmatpush3.bf16.msra.mxu0 %v2002_v41  ;;  %1868 = vmatpush3.bf16.msra.mxu1 %v2003_v42  ;;  %v2039_v41 = vld [vmem:[#allocation11 + $0x2c] ss:$16 sps:$4 sm:$0xff]   ;;  %v133_v42 = vpack.c.bf16 %v2534_v33, %v2534_v33 }
  0xa5   :  { %1847 = vmatprep.subr.bf16.mxu0 %v2004_v43  ;;  %1869 = vmatprep.subr.bf16.mxu1 %v2005_v44  ;;  %v2034_v43 = vld [vmem:[#allocation11 + $0x20] ss:$16 sps:$4 sm:$0xff]   ;;  %v2037_v44 = vld [vmem:[#allocation11 + $0x28] ss:$16 sps:$4 sm:$0xff]  }
  0xa8   :  { %1848 = vmatpush3.bf16.msra.mxu0 %v2006_v45  ;;  %1870 = vmatpush3.bf16.msra.mxu1 %v2007_v46  ;;  %v2042_v45 = vld [vmem:[#allocation11 + $0x44] ss:$16 sps:$4 sm:$0xff]   ;;  %v2045_v46 = vld [vmem:[#allocation11 + $0x4c] ss:$16 sps:$4 sm:$0xff]  }
  0xa9   :  { %1849 = vmatprep.subr.bf16.mxu0 %v2008_v47  ;;  %1871 = vmatprep.subr.bf16.mxu1 %v2009_v48  ;;  %v2040_v47 = vld [vmem:[#allocation11 + $0x40] ss:$16 sps:$4 sm:$0xff]   ;;  %v2043_v48 = vld [vmem:[#allocation11 + $0x48] ss:$16 sps:$4 sm:$0xff]  }
  0xac   :  { %1850 = vmatpush3.bf16.msra.mxu0 %v2010_v49  ;;  %1872 = vmatpush3.bf16.msra.mxu1 %v2011_v50  ;;  %v2048_v49 = vld [vmem:[#allocation11 + $0x64] ss:$16 sps:$4 sm:$0xff]   ;;  %v2051_v50 = vld [vmem:[#allocation11 + $0x6c] ss:$16 sps:$4 sm:$0xff]  }
  0xad   :  { %1851 = vmatprep.subr.bf16.mxu0 %v2012_v51  ;;  %1873 = vmatprep.subr.bf16.mxu1 %v2013_v52  ;;  %v2046_v51 = vld [vmem:[#allocation11 + $0x60] ss:$16 sps:$4 sm:$0xff]   ;;  %v2049_v52 = vld [vmem:[#allocation11 + $0x68] ss:$16 sps:$4 sm:$0xff]  }
  0xb0   :  { %1852 = vmatpush3.bf16.msra.mxu0 %v2014_v53  ;;  %1874 = vmatpush3.bf16.msra.mxu1 %v2015_v54  ;;  %v2054_v53 = vld [vmem:[#allocation11 + $0x84] ss:$16 sps:$4 sm:$0xff]   ;;  %v2057_v54 = vld [vmem:[#allocation11 + $0x8c] ss:$16 sps:$4 sm:$0xff]  }
  0xb1   :  { %1853 = vmatprep.subr.bf16.mxu0 %v2016_v55  ;;  %1875 = vmatprep.subr.bf16.mxu1 %v2017_v56  ;;  %v2052_v55 = vld [vmem:[#allocation11 + $0x80] ss:$16 sps:$4 sm:$0xff]   ;;  %v2055_v56 = vld [vmem:[#allocation11 + $0x88] ss:$16 sps:$4 sm:$0xff]  }
  0xb4   :  { %1854 = vmatpush3.bf16.msra.mxu0 %v2018_v57  ;;  %1876 = vmatpush3.bf16.msra.mxu1 %v2019_v58  ;;  %v2060_v57 = vld [vmem:[#allocation11 + $0xa4] ss:$16 sps:$4 sm:$0xff]   ;;  %v2063_v58 = vld [vmem:[#allocation11 + $0xac] ss:$16 sps:$4 sm:$0xff]  }
  0xb5   :  { %1855 = vmatprep.subr.bf16.mxu0 %v2020_v59  ;;  %1877 = vmatprep.subr.bf16.mxu1 %v2021_v60  ;;  %v2058_v59 = vld [vmem:[#allocation11 + $0xa0] ss:$16 sps:$4 sm:$0xff]   ;;  %v2061_v60 = vld [vmem:[#allocation11 + $0xa8] ss:$16 sps:$4 sm:$0xff]  }
  0xb8   :  { %1856 = vmatpush3.bf16.msra.mxu0 %v2022_v61  ;;  %1878 = vmatpush3.bf16.msra.mxu1 %v2023_v62  ;;  %v2066_v61 = vld [vmem:[#allocation11 + $0xc4] ss:$16 sps:$4 sm:$0xff]   ;;  %v2069_v62 = vld [vmem:[#allocation11 + $0xcc] ss:$16 sps:$4 sm:$0xff]  }
  0xb9   :  { %1857 = vmatprep.subr.bf16.mxu0 %v2024_v63  ;;  %1879 = vmatprep.subr.bf16.mxu1 %v2025_v0  ;;  %v2064_v63 = vld [vmem:[#allocation11 + $0xc0] ss:$16 sps:$4 sm:$0xff]   ;;  %v2067_v0 = vld [vmem:[#allocation11 + $0xc8] ss:$16 sps:$4 sm:$0xff]  }
  0xbc   :  { %1858 = vmatpush3.bf16.msra.mxu0 %v2026_v1  ;;  %1880 = vmatpush3.bf16.msra.mxu1 %v2027_v2  ;;  %v2072_v1 = vld [vmem:[#allocation11 + $0xe4] ss:$16 sps:$4 sm:$0xff]   ;;  %v2075_v2 = vld [vmem:[#allocation11 + $0xec] ss:$16 sps:$4 sm:$0xff]  }
  0xbd   :  { %1207 = vmatprep.subr.bf16.mxu0 %v2030_v3  ;;  %1248 = vmatprep.subr.bf16.mxu1 %v2033_v4  ;;  %v2070_v3 = vld [vmem:[#allocation11 + $0xe0] ss:$16 sps:$4 sm:$0xff]   ;;  %v2073_v4 = vld [vmem:[#allocation11 + $0xe8] ss:$16 sps:$4 sm:$0xff]  }
 0x172   :  { %v382_v16 = vpop.f32.mrb[0].mxu0  ;;  %v423_v17 = vpop.f32.mrb[0].mxu1 }
 0x173   :  { %v383_v18 = vadd.f32 %v382_v16, %v171_v12  ;;  %v424_v19 = vadd.f32 %v423_v17, %v179_v13  ;;  %v384_v20 = vpop.f32.mrb[1].mxu0  ;;  %v425_v21 = vpop.f32.mrb[1].mxu1  ;;  %v2076_v12 = vld [vmem:[#allocation11 + $0x100] ss:$16 sps:$4 sm:$0xff]   ;;  %v2079_v13 = vld [vmem:[#allocation11 + $0x108] ss:$16 sps:$4 sm:$0xff]  }
 0x174   :  { %v385_v22 = vadd.f32 %v384_v20, %v175_v14  ;;  %v426_v23 = vadd.f32 %v425_v21, %v183_v15  ;;  %v386_v24 = vpop.f32.mrb[2].mxu0  ;;  %v427_v25 = vpop.f32.mrb[2].mxu1  ;;  %v2084_v14 = vld [vmem:[#allocation11 + $0x124] ss:$16 sps:$4 sm:$0xff]   ;;  %v2087_v15 = vld [vmem:[#allocation11 + $0x12c] ss:$16 sps:$4 sm:$0xff]  }
 0x175   :  { %v430_v26 = vmax.f32 %v383_v18, 0.0  ;;  %v432_v27 = vmax.f32 %v424_v19, 0.0  ;;  %v387_v28 = vpop.f32.mrb[3].mxu0  ;;  %v428_v29 = vpop.f32.mrb[3].mxu1  ;;  %v2082_v16 = vld [vmem:[#allocation11 + $0x120] ss:$16 sps:$4 sm:$0xff]  }
 0x176   :  { %v431_v30 = vmax.f32 %v385_v22, 0.0  ;;  %v433_v31 = vmax.f32 %v426_v23, 0.0  ;;  %v2085_v17 = vld [vmem:[#allocation11 + $0x128] ss:$16 sps:$4 sm:$0xff]   ;;  %v2090_v18 = vld [vmem:[#allocation11 + $0x144] ss:$16 sps:$4 sm:$0xff]  }
 0x177   :  { %v436_v32 = vpack.c.bf16 %v432_v27, %v432_v27  ;;  %v434_v39 = vpack.c.bf16 %v430_v26, %v430_v26  ;;  %v2093_v19 = vld [vmem:[#allocation11 + $0x14c] ss:$16 sps:$4 sm:$0xff]   ;;  %v2088_v20 = vld [vmem:[#allocation11 + $0x140] ss:$16 sps:$4 sm:$0xff]   ;;  %v2091_v21 = vld [vmem:[#allocation11 + $0x148] ss:$16 sps:$4 sm:$0xff]  }
 0x178   :  { %v435_v34 = vpack.c.bf16 %v431_v30, %v431_v30  ;;  %v437_v35 = vpack.c.bf16 %v433_v31, %v433_v31  ;;  %v2096_v22 = vld [vmem:[#allocation11 + $0x164] ss:$16 sps:$4 sm:$0xff]   ;;  %v2099_v23 = vld [vmem:[#allocation11 + $0x16c] ss:$16 sps:$4 sm:$0xff]   ;;  %v2094_v24 = vld [vmem:[#allocation11 + $0x160] ss:$16 sps:$4 sm:$0xff]  }
 0x179   :  { %v2097_v25 = vld [vmem:[#allocation11 + $0x168] ss:$16 sps:$4 sm:$0xff]   ;;  %v2102_v26 = vld [vmem:[#allocation11 + $0x184] ss:$16 sps:$4 sm:$0xff]   ;;  %v2105_v27 = vld [vmem:[#allocation11 + $0x18c] ss:$16 sps:$4 sm:$0xff]  }
 0x17a   :  { %733 = vmatprep.mubr.bf16.mxu0 %v435_v34  ;;  %773 = vmatprep.mubr.bf16.mxu1 %v437_v35  ;;  %v2100_v28 = vld [vmem:[#allocation11 + $0x180] ss:$16 sps:$4 sm:$0xff]   ;;  %v2103_v29 = vld [vmem:[#allocation11 + $0x188] ss:$16 sps:$4 sm:$0xff]   ;;  %v2108_v30 = vld [vmem:[#allocation11 + $0x1a4] ss:$16 sps:$4 sm:$0xff]  }
 0x17b   :  { %734 = vmatmul.mubr.bf16.vlgmr.msra.gmra.mrb[4].mxu0 %v434_v39  ;;  %774 = vmatmul.mubr.bf16.vlgmr.msra.gmra.mrb[4].mxu1 %v436_v32  ;;  %v2111_v31 = vld [vmem:[#allocation11 + $0x1ac] ss:$16 sps:$4 sm:$0xff]   ;;  %v2106_v32 = vld [vmem:[#allocation11 + $0x1a0] ss:$16 sps:$4 sm:$0xff]   ;;  %v2109_v34 = vld [vmem:[#allocation11 + $0x1a8] ss:$16 sps:$4 sm:$0xff]  }
 0x17c   :  { %1208 = vmatpush1.bf16.msra.mxu0 %v2028_v36  ;;  %1249 = vmatpush1.bf16.msra.mxu1 %v2031_v38  ;;  %v2114_v35 = vld [vmem:[#allocation11 + $0x1c4] ss:$16 sps:$4 sm:$0xff]   ;;  %v2117_v36 = vld [vmem:[#allocation11 + $0x1cc] ss:$16 sps:$4 sm:$0xff]   ;;  %v2112_v38 = vld [vmem:[#allocation11 + $0x1c0] ss:$16 sps:$4 sm:$0xff]  }
 0x17d   :  { %1209 = vmatprep.subr.bf16.mxu0 %v2036_v40  ;;  %1250 = vmatprep.subr.bf16.mxu1 %v2039_v41  ;;  %v2115_v39 = vld [vmem:[#allocation11 + $0x1c8] ss:$16 sps:$4 sm:$0xff]   ;;  %v2120_v40 = vld [vmem:[#allocation11 + $0x1e4] ss:$16 sps:$4 sm:$0xff]   ;;  %v2123_v41 = vld [vmem:[#allocation11 + $0x1ec] ss:$16 sps:$4 sm:$0xff]  }
 0x17e   :  { %1239 = vmatprep.mubr.bf16.mxu0 %v133_v42  ;;  %1280 = vmatprep.mubr.bf16.mxu1 %v133_v42  ;;  %v2118_v42 = vld [vmem:[#allocation11 + $0x1e0] ss:$16 sps:$4 sm:$0xff]  }
 0x180   :  { %1210 = vmatpush1.bf16.msra.mxu0 %v2034_v43  ;;  %1251 = vmatpush1.bf16.msra.mxu1 %v2037_v44  ;;  %v2121_v43 = vld [vmem:[#allocation11 + $0x1e8] ss:$16 sps:$4 sm:$0xff]   ;;  %v2124_v44 = vld [vmem:[#allocation13 + $0x40] sm:$0xff]  }
 0x181   :  { %1211 = vmatprep.subr.bf16.mxu0 %v2042_v45  ;;  %1252 = vmatprep.subr.bf16.mxu1 %v2045_v46  ;;  %v2125_v45 = vld [vmem:[#allocation13 + $0xc0] sm:$0xff]  }
 0x182   :  { %v2126_v46 = vld [vmem:[#allocation13] sm:$0xff]  }
 0x184   :  { %1212 = vmatpush1.bf16.msra.mxu0 %v2040_v47  ;;  %1253 = vmatpush1.bf16.msra.mxu1 %v2043_v48  ;;  %v2127_v47 = vld [vmem:[#allocation13 + $0x80] sm:$0xff]   ;;  %v2128_v48 = vld [vmem:[#allocation13 + $0x48] sm:$0xff]  }
 0x185   :  { %1213 = vmatprep.subr.bf16.mxu0 %v2048_v49  ;;  %1254 = vmatprep.subr.bf16.mxu1 %v2051_v50  ;;  %v2129_v49 = vld [vmem:[#allocation13 + $0xc8] sm:$0xff]  }
 0x186   :  { %v2130_v50 = vld [vmem:[#allocation13 + $0x8] sm:$0xff]  }
 0x188   :  { %1214 = vmatpush1.bf16.msra.mxu0 %v2046_v51  ;;  %1255 = vmatpush1.bf16.msra.mxu1 %v2049_v52  ;;  %v2131_v51 = vld [vmem:[#allocation13 + $0x88] sm:$0xff]   ;;  %v2132_v52 = vld [vmem:[#allocation13 + $0x50] sm:$0xff]  }
 0x189   :  { %1215 = vmatprep.subr.bf16.mxu0 %v2054_v53  ;;  %1256 = vmatprep.subr.bf16.mxu1 %v2057_v54  ;;  %v2133_v53 = vld [vmem:[#allocation13 + $0xd0] sm:$0xff]  }
 0x18a   :  { %v2134_v54 = vld [vmem:[#allocation13 + $0x10] sm:$0xff]  }
 0x18c   :  { %1216 = vmatpush1.bf16.msra.mxu0 %v2052_v55  ;;  %1257 = vmatpush1.bf16.msra.mxu1 %v2055_v56  ;;  %v2136_v55 = vld [vmem:[#allocation13 + $0x58] sm:$0xff]  }
 0x18d   :  { %1217 = vmatprep.subr.bf16.mxu0 %v2060_v57  ;;  %1258 = vmatprep.subr.bf16.mxu1 %v2063_v58  ;;  %v2137_v56 = vld [vmem:[#allocation13 + $0xd8] sm:$0xff]  }
 0x18e   :  { %v2138_v57 = vld [vmem:[#allocation13 + $0x18] sm:$0xff]  }
 0x18f   :  { %v2139_v58 = vld [vmem:[#allocation13 + $0x98] sm:$0xff]  }
 0x190   :  { %1218 = vmatpush1.bf16.msra.mxu0 %v2058_v59  ;;  %1259 = vmatpush1.bf16.msra.mxu1 %v2061_v60  ;;  %v2140_v59 = vld [vmem:[#allocation13 + $0x60] sm:$0xff]  }
 0x191   :  { %1219 = vmatprep.subr.bf16.mxu0 %v2066_v61  ;;  %1260 = vmatprep.subr.bf16.mxu1 %v2069_v62  ;;  %v2141_v60 = vld [vmem:[#allocation13 + $0xe0] sm:$0xff]  }
 0x192   :  { %v2142_v61 = vld [vmem:[#allocation13 + $0x20] sm:$0xff]  }
 0x193   :  { %v2143_v62 = vld [vmem:[#allocation13 + $0xa0] sm:$0xff]  }
 0x194   :  { %1220 = vmatpush1.bf16.msra.mxu0 %v2064_v63  ;;  %1261 = vmatpush1.bf16.msra.mxu1 %v2067_v0  ;;  %v2144_v63 = vld [vmem:[#allocation13 + $0x68] sm:$0xff]  }
 0x195   :  { %1221 = vmatprep.subr.bf16.mxu0 %v2072_v1  ;;  %1262 = vmatprep.subr.bf16.mxu1 %v2075_v2  ;;  %v2145_v0 = vld [vmem:[#allocation13 + $0xe8] sm:$0xff]  }
 0x196   :  { %v2146_v1 = vld [vmem:[#allocation13 + $0x28] sm:$0xff]  }
 0x197   :  { %v2147_v2 = vld [vmem:[#allocation13 + $0xa8] sm:$0xff]  }
 0x198   :  { %1222 = vmatpush1.bf16.msra.mxu0 %v2070_v3  ;;  %1263 = vmatpush1.bf16.msra.mxu1 %v2073_v4  ;;  %v2148_v3 = vld [vmem:[#allocation13 + $0x70] sm:$0xff]  }
 0x199   :  { %1223 = vmatprep.subr.bf16.mxu0 %v2078_v5  ;;  %1264 = vmatprep.subr.bf16.mxu1 %v2081_v9  ;;  %v2149_v4 = vld [vmem:[#allocation13 + $0xf0] sm:$0xff]  }
 0x19a   :  { %v2150_v5 = vld [vmem:[#allocation13 + $0x30] sm:$0xff]  }
 0x19b   :  { %v2151_v9 = vld [vmem:[#allocation13 + $0xb0] sm:$0xff]  }
 0x19c   :  { %1224 = vmatpush1.bf16.msra.mxu0 %v2076_v12  ;;  %1265 = vmatpush1.bf16.msra.mxu1 %v2079_v13  ;;  %v2152_v12 = vld [vmem:[#allocation13 + $0x78] sm:$0xff]  }
 0x19d   :  { %1225 = vmatprep.subr.bf16.mxu0 %v2084_v14  ;;  %1266 = vmatprep.subr.bf16.mxu1 %v2087_v15  ;;  %v2153_v13 = vld [vmem:[#allocation13 + $0xf8] sm:$0xff]  }
 0x19e   :  { %v2154_v14 = vld [vmem:[#allocation13 + $0x38] sm:$0xff]  }
 0x19f   :  { %v2155_v15 = vld [vmem:[#allocation13 + $0xb8] sm:$0xff]  }
 0x1a0   :  { %1226 = vmatpush1.bf16.msra.mxu0 %v2082_v16  ;;  %1267 = vmatpush1.bf16.msra.mxu1 %v2085_v17  ;;  %v781_v16 = vrot.slane %v2534_v33, 4 }
 0x1a1   :  { %1227 = vmatprep.subr.bf16.mxu0 %v2090_v18  ;;  %1268 = vmatprep.subr.bf16.mxu1 %v2093_v19 }
 0x1a2   :  { %v782_v17 = vadd.f32 %v781_v16, %v2534_v33  ;;  %v1810_v16 = vld [vmem:[%s2582_s10] ss:$0 sm:$0xff] }
 0x1a4   :  { %1228 = vmatpush1.bf16.msra.mxu0 %v2088_v20  ;;  %1269 = vmatpush1.bf16.msra.mxu1 %v2091_v21  ;;  %v783_v18 = vrot.slane %v782_v17, 2 }
 0x1a5   :  { %1229 = vmatprep.subr.bf16.mxu0 %v2096_v22  ;;  %1270 = vmatprep.subr.bf16.mxu1 %v2099_v23 }
 0x1a6   :  { %v784_v19 = vadd.f32 %v783_v18, %v782_v17 }
 0x1a8   :  { %1230 = vmatpush1.bf16.msra.mxu0 %v2094_v24  ;;  %1271 = vmatpush1.bf16.msra.mxu1 %v2097_v25  ;;  %v785_v20 = vrot.slane %v784_v19, 1  ;;  %v1713_v25 = vld [vmem:[%s2578_s6] ss:$0 sm:$0xff] }
 0x1a9   :  { %1231 = vmatprep.subr.bf16.mxu0 %v2102_v26  ;;  %1272 = vmatprep.subr.bf16.mxu1 %v2105_v27 }
 0x1aa   :  { %v786_v21 = vadd.f32 %v785_v20, %v784_v19 }
 0x1ac   :  { %1232 = vmatpush1.bf16.msra.mxu0 %v2100_v28  ;;  %1273 = vmatpush1.bf16.msra.mxu1 %v2103_v29  ;;  %v788_v24 = vmul.f32 0.125, %v786_v21 }
 0x1ad   :  { %1233 = vmatprep.subr.bf16.mxu0 %v2108_v30  ;;  %1274 = vmatprep.subr.bf16.mxu1 %v2111_v31 }
 0x1b0   :  { %1234 = vmatpush1.bf16.msra.mxu0 %v2106_v32  ;;  %1275 = vmatpush1.bf16.msra.mxu1 %v2109_v34 }
 0x1b1   :  { %1235 = vmatprep.subr.bf16.mxu0 %v2114_v35  ;;  %1276 = vmatprep.subr.bf16.mxu1 %v2117_v36  ;;  %v789_v36 = vsub.f32 %v2534_v33, %v788_v24 }
 0x1b4   :  { %1236 = vmatpush1.bf16.msra.mxu0 %v2112_v38  ;;  %1277 = vmatpush1.bf16.msra.mxu1 %v2115_v39 }
 0x1b5   :  { %1237 = vmatprep.subr.bf16.mxu0 %v2120_v40  ;;  %1278 = vmatprep.subr.bf16.mxu1 %v2123_v41  ;;  %v865_v40 = vld [vmem:[%s2580_s8] sm:$0xf] }
 0x1b6   :  { %v870_v41 = vrot.slane %v865_v40, %v170_v7 }
 0x1b8   :  { %1238 = vmatpush1.bf16.msra.mxu0 %v2118_v42  ;;  %1279 = vmatpush1.bf16.msra.mxu1 %v2121_v43  ;;  %v878_v42 = vrot.slane %v865_v40, %v178_v8  ;;  %v874_v43 = vrot.slane %v865_v40, %v174_v10 }
 0x1b9   :  { %1887 = vmatprep.subr.bf16.mxu0 %v2124_v44  ;;  %1909 = vmatprep.subr.bf16.mxu1 %v2125_v45  ;;  %v882_v44 = vrot.slane %v865_v40, %v182_v11 }
 0x1bb   :  { %1240 = vmatmul.mubr.bf16.vlgmr.msra.gmra.mrb[8].mxu0 %v2513_v37  ;;  %1281 = vmatmul.mubr.bf16.vlgmr.msra.gmra.mrb[8].mxu1 %v2513_v37  ;;  %v2135_v37 = vld [vmem:[#allocation13 + $0x90] sm:$0xff]  }
 0x1bc   :  { %1888 = vmatpush3.bf16.msra.mxu0 %v2126_v46  ;;  %1910 = vmatpush3.bf16.msra.mxu1 %v2127_v47 }
 0x1bd   :  { %1889 = vmatprep.subr.bf16.mxu0 %v2128_v48  ;;  %1911 = vmatprep.subr.bf16.mxu1 %v2129_v49 }
 0x1c0   :  { %1890 = vmatpush3.bf16.msra.mxu0 %v2130_v50  ;;  %1912 = vmatpush3.bf16.msra.mxu1 %v2131_v51 }
 0x1c1   :  { %1891 = vmatprep.subr.bf16.mxu0 %v2132_v52  ;;  %1913 = vmatprep.subr.bf16.mxu1 %v2133_v53 }
 0x1c4   :  { %1892 = vmatpush3.bf16.msra.mxu0 %v2134_v54  ;;  %1914 = vmatpush3.bf16.msra.mxu1 %v2135_v37 }
 0x1c5   :  { %1893 = vmatprep.subr.bf16.mxu0 %v2136_v55  ;;  %1915 = vmatprep.subr.bf16.mxu1 %v2137_v56 }
 0x1c8   :  { %1894 = vmatpush3.bf16.msra.mxu0 %v2138_v57  ;;  %1916 = vmatpush3.bf16.msra.mxu1 %v2139_v58 }
 0x1c9   :  { %1895 = vmatprep.subr.bf16.mxu0 %v2140_v59  ;;  %1917 = vmatprep.subr.bf16.mxu1 %v2141_v60 }
 0x1cc   :  { %1896 = vmatpush3.bf16.msra.mxu0 %v2142_v61  ;;  %1918 = vmatpush3.bf16.msra.mxu1 %v2143_v62 }
 0x1cd   :  { %1897 = vmatprep.subr.bf16.mxu0 %v2144_v63  ;;  %1919 = vmatprep.subr.bf16.mxu1 %v2145_v0 }
 0x1d0   :  { %1898 = vmatpush3.bf16.msra.mxu0 %v2146_v1  ;;  %1920 = vmatpush3.bf16.msra.mxu1 %v2147_v2  ;;  %v131_v1 = vld [vmem:[#allocation7] sm:$0xff] }
 0x1d1   :  { %1899 = vmatprep.subr.bf16.mxu0 %v2148_v3  ;;  %1921 = vmatprep.subr.bf16.mxu1 %v2149_v4  ;;  %v1640_v2 = vrot.slane %v131_v1, 4 }
 0x1d3   :  { %v1641_v3 = vadd.f32 %v1640_v2, %v131_v1 }
 0x1d4   :  { %1900 = vmatpush3.bf16.msra.mxu0 %v2150_v5  ;;  %1922 = vmatpush3.bf16.msra.mxu1 %v2151_v9 }
 0x1d5   :  { %1901 = vmatprep.subr.bf16.mxu0 %v2152_v12  ;;  %1923 = vmatprep.subr.bf16.mxu1 %v2153_v13  ;;  %v1642_v4 = vrot.slane %v1641_v3, 2 }
 0x1d7   :  { %v1643_v5 = vadd.f32 %v1642_v4, %v1641_v3 }
 0x1d8   :  { %1902 = vmatpush3.bf16.msra.mxu0 %v2154_v14  ;;  %1924 = vmatpush3.bf16.msra.mxu1 %v2155_v15 }
 0x1d9   :  { %v1644_v9 = vrot.slane %v1643_v5, 1 }
 0x1db   :  { %v1645_v12 = vadd.f32 %v1644_v9, %v1643_v5 }
 0x1dd   :  { %v1646_v15 = vmul.f32 0.125, %v1645_v12 }
 0x24e   :  { %v1859_v22 = vpop.f32.mrb[4].mxu0  ;;  %v1881_v23 = vpop.f32.mrb[4].mxu1 }
 0x24f   :  { %v1860_v26 = vpop.f32.mrb[5].mxu0  ;;  %v1882_v27 = vpop.f32.mrb[5].mxu1 }
 0x250   :  { %v1861_v28 = vadd.f32 %v1860_v26, %v1859_v22  ;;  %v1883_v29 = vadd.f32 %v1882_v27, %v1881_v23  ;;  %v1862_v30 = vpop.f32.mrb[6].mxu0  ;;  %v1884_v31 = vpop.f32.mrb[6].mxu1  ;;  %v1647_v26 = vsub.f32 %v131_v1, %v1646_v15 }
 0x251   :  { %v1863_v32 = vpop.f32.mrb[7].mxu0  ;;  %v1885_v34 = vpop.f32.mrb[7].mxu1 }
 0x252   :  { %v736_v35 = vadd.f32 %v1861_v28, %v1713_v25 }
 0x254   :  { %v776_v38 = vadd.f32 %v1883_v29, %v736_v35 }
 0x256   :  { %v790_v39 = vmul.f32 %v789_v36, %v776_v38 }
 0x258   :  { %791 = vadd.xlane.f32.xlu0 %v790_v39 }
 0x28e   :  { %v1241_v33 = vpop.f32.mrb[8].mxu0  ;;  %v1282_v45 = vpop.f32.mrb[8].mxu1 }
 0x28f   :  { %v1242_v46 = vadd.f32 %v1241_v33, %v870_v41  ;;  %v1283_v47 = vadd.f32 %v1282_v45, %v878_v42  ;;  %v1243_v48 = vpop.f32.mrb[9].mxu0  ;;  %v1284_v49 = vpop.f32.mrb[9].mxu1 }
 0x290   :  { %v1244_v50 = vadd.f32 %v1243_v48, %v874_v43  ;;  %v1285_v51 = vadd.f32 %v1284_v49, %v882_v44  ;;  %v1245_v52 = vpop.f32.mrb[10].mxu0  ;;  %v1286_v53 = vpop.f32.mrb[10].mxu1 }
 0x291   :  { %v1289_v7 = vmax.f32 %v1242_v46, 0.0  ;;  %v1291_v54 = vmax.f32 %v1283_v47, 0.0  ;;  %v1246_v37 = vpop.f32.mrb[11].mxu0  ;;  %v1287_v8 = vpop.f32.mrb[11].mxu1 }
 0x292   :  { %v1290_v55 = vmax.f32 %v1244_v50, 0.0  ;;  %v1292_v56 = vmax.f32 %v1285_v51, 0.0 }
 0x293   :  { %v1295_v10 = vpack.c.bf16 %v1291_v54, %v1291_v54  ;;  %v1293_v11 = vpack.c.bf16 %v1289_v7, %v1289_v7 }
 0x294   :  { %v1294_v57 = vpack.c.bf16 %v1290_v55, %v1290_v55  ;;  %v1296_v6 = vpack.c.bf16 %v1292_v56, %v1292_v56 }
 0x296   :  { %1592 = vmatprep.mubr.bf16.mxu0 %v1294_v57  ;;  %1632 = vmatprep.mubr.bf16.mxu1 %v1296_v6 }
 0x297   :  { %1593 = vmatmul.mubr.bf16.vlgmr.msra.gmra.mrb[12].mxu0 %v1293_v11  ;;  %1633 = vmatmul.mubr.bf16.vlgmr.msra.gmra.mrb[12].mxu1 %v1295_v10 }
 0x2e5   :  { %v792_v58 = vpop.xlane.xlu0 %791 }
 0x2e6   :  { %v793_v59 = vrot.slane %v792_v58, 4 }
 0x2e8   :  { %v794_v60 = vadd.f32 %v793_v59, %v792_v58 }
 0x2ea   :  { %v795_v61 = vrot.slane %v794_v60, 2 }
 0x2ec   :  { %v796_v62 = vadd.f32 %v795_v61, %v794_v60 }
 0x2ee   :  { %v797_v63 = vrot.slane %v796_v62, 1 }
 0x2f0   :  { %v798_v0 = vadd.f32 %v797_v63, %v796_v62 }
 0x2f2   :  { %1931 = vpush %v798_v0 }
 0x323   :  { %s1932_s10 = spop %1931 }
 0x324   :  { %s800_s23 = smul.f32 0.125, %s1932_s10 }
 0x36a   :  { %v1903_v13 = vpop.f32.mrb[12].mxu0  ;;  %v1925_v14 = vpop.f32.mrb[12].mxu1 }
 0x36b   :  { %v1904_v17 = vpop.f32.mrb[13].mxu0  ;;  %v1926_v18 = vpop.f32.mrb[13].mxu1 }
 0x36c   :  { %v1905_v19 = vadd.f32 %v1904_v17, %v1903_v13  ;;  %v1927_v20 = vadd.f32 %v1926_v18, %v1925_v14  ;;  %v1906_v21 = vpop.f32.mrb[14].mxu0  ;;  %v1928_v22 = vpop.f32.mrb[14].mxu1 }
 0x36d   :  { %v1907_v23 = vpop.f32.mrb[15].mxu0  ;;  %v1929_v24 = vpop.f32.mrb[15].mxu1 }
 0x36e   :  { %v1595_v25 = vadd.f32 %v1905_v19, %v1810_v16 }
 0x370   :  { %v1635_v27 = vadd.f32 %v1927_v20, %v1595_v25 }
 0x372   :  { %v1648_v28 = vmul.f32 %v1647_v26, %v1635_v27 }
 0x374   :  { %1649 = vadd.xlane.f32.xlu0 %v1648_v28 }
 0x401   :  { %v1650_v29 = vpop.xlane.xlu0 %1649 }
 0x402   :  { %v1651_v30 = vrot.slane %v1650_v29, 4 }
 0x404   :  { %v1652_v31 = vadd.f32 %v1651_v30, %v1650_v29 }
 0x406   :  { %v1653_v32 = vrot.slane %v1652_v31, 2 }
 0x408   :  { %v1654_v34 = vadd.f32 %v1653_v32, %v1652_v31 }
 0x40a   :  { %v1655_v35 = vrot.slane %v1654_v34, 1 }
 0x40c   :  { %v1656_v36 = vadd.f32 %v1655_v35, %v1654_v34 }
 0x40e   :  { %1933 = vpush %v1656_v36 }
 0x43f   :  { %s1934_s24 = spop %1933 }
 0x440   :  { %s1658_s26 = smul.f32 0.125, %s1934_s24 }
 0x442   :  { %s1659_s2 = sadd.f32 %s1658_s26, %s800_s23 }
 0x444   :  { %v1660_v38 = vstv %s1659_s2 }
 0x445   :  { %1662 = vst.msk [vmem:[#allocation14] sm:$0x1] %vm1661_vm0, %v1660_v38 }
 0x446   :  { %2321 = shalt.err (!%p2318_p4)
}
 0x447   :  { %s2322_s12 = scalar_lea.hbm %s2583_s11, 16 }
 0x448   :  { %p2323_p5 = scmp.ne.s32.totalorder %s2583_s11, %s2322_s12  ;;  %p2326_p6 = scmp.lt.u32.totalorder %s2322_s12, %s2583_s11 }
 0x44a   :  { %p2328_p7 = pnand %p2326_p6, %p2323_p5 }
 0x44c   :  { %2331 = shalt.err (!%p2328_p7)
}
 0x44d   :  { %1672 = dma.vmem_to_hbm [thread:$0]  %s1670_s7, 16, %s2583_s11, [#allocation4]  }
 0x44e   :  { %2340 = dma.done.wait [#allocation4], 16  }
 0x44f   :  { %2341 = vsyncadd [#allocation4], 4294967280 }
 0x450   :  { %1676 = vsyncpa [#allocation3], 1 }
 0x451   :  { %1677 = vsyncpa [#allocation6], 1 }
 0x452   :  { %1678 = vsyncpa [#allocation9], 1 }
 0x453   :  { %1679 = vsyncpa [#allocation12], 1 }
 0x454   :  { %1680 = vsyncpa [#allocation4], 1 }

</bundles_post_ra>
